<compile_context>
chip_gen: v7x
topology: tpu7x:2x2x1
jax: 0.10.0
libtpu: 0.0.40
codegen_flags: <defaults>
</compile_context>

<pallas_src>
import functools

import jax
import jax.numpy as jnp
from jax.experimental import pallas as pl
from jax.experimental.pallas import tpu as pltpu


def _hinge_sum_kernel(x_ref, out_ref, acc_ref, *, weights, margin, lane_tile,
                      batch, needs_mask):
    # x_ref  : (S, T) block of cossim in its native dtype (VMEM).
    #          row 0 = paired, row 1 = unpaired #1, (row 2 = unpaired #2).
    # out_ref: (1, 1) f32 scalar loss (SMEM), written only at the last step.
    # acc_ref: (1, T) f32 VMEM partial-sum accumulator (persists across grid).
    # weights: python floats, already divided by batch_size.
    i = pl.program_id(0)

    @pl.when(i == 0)
    def _init():
        acc_ref[...] = jnp.zeros_like(acc_ref)

    x = x_ref[...].astype(jnp.float32)            # native dtype -> f32 in-kernel
    d = margin - x[0:1, :]                        # shared by all hinge terms
    loss = weights[0] * jnp.maximum(d + x[1:2, :], 0.0)
    if len(weights) == 2:
        loss = loss + weights[1] * jnp.maximum(d + x[2:3, :], 0.0)

    if needs_mask:
        # Pad lanes of the (oversized) last block contain garbage; select them
        # to exactly 0 (jnp.where does not propagate NaN from the dead branch).
        lane = jax.lax.broadcasted_iota(jnp.int32, loss.shape, 1)
        loss = jnp.where(i * lane_tile + lane < batch, loss, 0.0)

    acc_ref[...] += loss                          # VPU-only per-step body

    @pl.when(i == pl.num_programs(0) - 1)
    def _finalize():
        out_ref[0, 0] = jnp.sum(acc_ref[...])     # one XLU cross-lane reduce


def max_margin_loss(cossim, visual_rank_weight, lang_rank_weight, margin, *,
                    lane_tile=4096, small_batch_threshold=256,
                    force_pallas=False):
    """Forward pass of MaxMarginCriterion. `cossim` has shape (N,)."""
    visual = visual_rank_weight > 0
    lang = lang_rank_weight > 0
    N = int(cossim.shape[0])

    if visual and lang:
        S = 3
        weights = (float(visual_rank_weight), float(lang_rank_weight))
    elif visual or lang:
        S = 2
        weights = (float(visual_rank_weight) if visual else float(lang_rank_weight),)
    else:
        raise NotImplementedError

    B = N // S
    assert S * B == N, f"cossim length {N} must be a multiple of {S}"
    margin = float(margin)

    # Contiguous (S, B) view: no pad, no dtype convert in the wrapper.
    x = cossim.reshape(S, B)

    if B < small_batch_threshold and not force_pallas:
        # Tiny batches: fused XLA path -- the custom-call launch, sub-vreg DMA
        # and (1,1) readback would dominate the actual math.
        xf = x.astype(jnp.float32)
        d = margin - xf[0]
        loss = weights[0] * jnp.maximum(d + xf[1], 0.0)
        if len(weights) == 2:
            loss = loss + weights[1] * jnp.maximum(d + xf[2], 0.0)
        return jnp.sum(loss) / B

    # Lane-tile selection: multiple of 128, no larger than needed to cover B.
    lane_tile = max(128, (int(lane_tile) // 128) * 128)
    covered = 128 * pl.cdiv(B, 128)
    T = min(lane_tile, covered)
    num_blocks = pl.cdiv(B, T)
    needs_mask = (num_blocks * T != B)            # only then can pad lanes exist

    # Fold the mean (1/batch_size) into the compile-time weights.
    folded_w = tuple(w / float(B) for w in weights)

    kernel = functools.partial(
        _hinge_sum_kernel, weights=folded_w, margin=margin,
        lane_tile=T, batch=B, needs_mask=needs_mask)

    itemsize = jnp.dtype(x.dtype).itemsize
    cost = pl.CostEstimate(flops=5 * S * B, transcendentals=0,
                           bytes_accessed=S * B * itemsize + 4)

    out = pl.pallas_call(
        kernel,
        out_shape=jax.ShapeDtypeStruct((1, 1), jnp.float32),
        grid_spec=pltpu.PrefetchScalarGridSpec(
            num_scalar_prefetch=0,
            grid=(num_blocks,),
            in_specs=[pl.BlockSpec((S, T), lambda i: (0, i))],
            out_specs=pl.BlockSpec((1, 1), lambda i: (0, 0),
                                   memory_space=pltpu.MemorySpace.SMEM),
            scratch_shapes=[pltpu.VMEM((1, T), jnp.float32)]),
        compiler_params=pltpu.CompilerParams(
            dimension_semantics=("arbitrary",)),
        cost_estimate=cost,
    )(x)

    return out[0, 0]


def _reference(cossim, vw, lw, margin):
    # Pure-JAX reference mirroring the PyTorch forward exactly.
    N = cossim.shape[0]
    c = cossim.astype(jnp.float32)
    if vw > 0 and lw > 0:
        B = N // 3
        p, vu, lu = c[:B], c[B:2 * B], c[2 * B:]
        loss = (vw * jnp.maximum(margin + vu - p, 0.0)
                + lw * jnp.maximum(margin + lu - p, 0.0))
    else:
        B = N // 2
        p, u = c[:B], c[B:]
        w = vw if vw > 0 else lw
        loss = w * jnp.maximum(margin + u - p, 0.0)
    return loss.sum() / B


if __name__ == "__main__":
    key = jax.random.PRNGKey(0)
    margin = 0.1
    k1, k2, k3, k4 = jax.random.split(key, 4)

    # Case 1: both ranks, tiny batch -> fused jnp escape hatch (no Pallas launch).
    B1 = 8
    c1 = jax.random.normal(k1, (3 * B1,), dtype=jnp.float32)
    l1 = jax.block_until_ready(max_margin_loss(c1, 1.0, 1.0, margin))
    r1 = _reference(c1, 1.0, 1.0, margin)
    assert jnp.allclose(l1, r1, rtol=1e-5, atol=1e-5), (l1, r1)

    # Case 2: both ranks, ragged B -> multi-step grid + masked tail (Pallas path).
    B2 = 300
    c2 = jax.random.normal(k2, (3 * B2,), dtype=jnp.float32)
    l2 = jax.block_until_ready(
        max_margin_loss(c2, 2.0, 3.0, margin, lane_tile=256, force_pallas=True))
    r2 = _reference(c2, 2.0, 3.0, margin)
    assert jnp.allclose(l2, r2, rtol=1e-5, atol=1e-5), (l2, r2)

    # Case 3: visual-only (2-row kernel), lane-exact B, native bf16 DMA with
    # in-kernel upcast (no mask, no pad).
    B3 = 512
    c3 = jax.random.normal(k3, (2 * B3,), dtype=jnp.float32).astype(jnp.bfloat16)
    l3 = jax.block_until_ready(
        max_margin_loss(c3, 0.5, 0.0, margin, force_pallas=True))
    r3 = _reference(c3, 0.5, 0.0, margin)
    assert jnp.allclose(l3, r3, rtol=1e-5, atol=1e-5), (l3, r3)

    # Case 4: lang-only, single oversized block with masked tail (Pallas path).
    B4 = 130
    c4 = jax.random.normal(k4, (2 * B4,), dtype=jnp.float32)
    l4 = jax.block_until_ready(
        max_margin_loss(c4, 0.0, 0.7, margin, force_pallas=True))
    r4 = _reference(c4, 0.0, 0.7, margin)
    assert jnp.allclose(l4, r4, rtol=1e-5, atol=1e-5), (l4, r4)

    print("KERNEL_OK")
</pallas_src>

<mosaic_0001>
module attributes {stable_mosaic.version = 11 : i64} {
  func.func @_hinge_sum_kernel(%arg0: i32, %arg1: memref<3x256xf32, #tpu.memory_space<vmem>>, %arg2: memref<1x1xf32, #tpu.memory_space<smem>>, %arg3: memref<1x256xf32, #tpu.memory_space<vmem>>) attributes {dimension_semantics = [#tpu.dimension_semantics<arbitrary>], iteration_bounds = array<i64: 2>, scalar_prefetch = 0 : i64, scratch_operands = 1 : i64, tpu.core_type = #tpu.core_type<tc>, window_params = [{transform_indices = @transform_0, window_bounds = array<i64: 3, 256>}, {transform_indices = @transform_1, window_bounds = array<i64: 1, 1>}]} {
    %c0_i32 = arith.constant 0 : i32
    %0 = arith.cmpi eq, %arg0, %c0_i32 : i32
    %1 = arith.extui %0 : i1 to i32
    %c0_i32_0 = arith.constant 0 : i32
    %2 = arith.cmpi ne, %1, %c0_i32_0 : i32
    scf.if %2 {
      %cst_12 = arith.constant 0.000000e+00 : f32
      %34 = vector.broadcast %cst_12 : f32 to vector<1x256xf32>
      %c0_13 = arith.constant 0 : index
      %c0_14 = arith.constant 0 : index
      %35 = vector.load %arg3[%c0_13, %c0_14] : memref<1x256xf32, #tpu.memory_space<vmem>>, vector<1x256xf32>
      tpu.vector_store %arg3[%c0_13, %c0_14], %34 {strides = array<i32>} : memref<1x256xf32, #tpu.memory_space<vmem>>, vector<1x256xf32>,
    } else {
    }
    %c0 = arith.constant 0 : index
    %c0_1 = arith.constant 0 : index
    %3 = vector.load %arg1[%c0, %c0_1] : memref<3x256xf32, #tpu.memory_space<vmem>>, vector<3x256xf32>
    %4 = vector.extract_strided_slice %3 {offsets = [0, 0], sizes = [1, 256], strides = [1, 1]} : vector<3x256xf32> to vector<1x256xf32>
    %cst = arith.constant 1.000000e-01 : f32
    %5 = vector.broadcast %cst : f32 to vector<1x256xf32>
    %6 = arith.subf %5, %4 : vector<1x256xf32>
    %7 = vector.extract_strided_slice %3 {offsets = [1, 0], sizes = [1, 256], strides = [1, 1]} : vector<3x256xf32> to vector<1x256xf32>
    %8 = arith.addf %6, %7 : vector<1x256xf32>
    %cst_2 = arith.constant 0.000000e+00 : f32
    %9 = vector.broadcast %cst_2 : f32 to vector<1x256xf32>
    %10 = arith.maximumf %8, %9 : vector<1x256xf32>
    %cst_3 = arith.constant 0.00666666683 : f32
    %11 = vector.broadcast %cst_3 : f32 to vector<1x256xf32>
    %12 = arith.mulf %11, %10 : vector<1x256xf32>
    %13 = vector.extract_strided_slice %3 {offsets = [2, 0], sizes = [1, 256], strides = [1, 1]} : vector<3x256xf32> to vector<1x256xf32>
    %14 = arith.addf %6, %13 : vector<1x256xf32>
    %cst_4 = arith.constant 0.000000e+00 : f32
    %15 = vector.broadcast %cst_4 : f32 to vector<1x256xf32>
    %16 = arith.maximumf %14, %15 : vector<1x256xf32>
    %cst_5 = arith.constant 0.00999999977 : f32
    %17 = vector.broadcast %cst_5 : f32 to vector<1x256xf32>
    %18 = arith.mulf %17, %16 : vector<1x256xf32>
    %19 = arith.addf %12, %18 : vector<1x256xf32>
    %20 = tpu.iota {dimensions = array<i32: 1>} : vector<1x256xi32>
    %c256_i32 = arith.constant 256 : i32
    %21 = arith.muli %arg0, %c256_i32 : i32
    %22 = vector.broadcast %21 : i32 to vector<1x256xi32>
    %23 = arith.addi %22, %20 : vector<1x256xi32>
    %c300_i32 = arith.constant 300 : i32
    %24 = vector.broadcast %c300_i32 : i32 to vector<1x256xi32>
    %25 = arith.cmpi slt, %23, %24 : vector<1x256xi32>
    %cst_6 = arith.constant 0.000000e+00 : f32
    %26 = vector.broadcast %cst_6 : f32 to vector<1x256xf32>
    %27 = arith.select %25, %19, %26 : vector<1x256xi1>, vector<1x256xf32>
    %c0_7 = arith.constant 0 : index
    %c0_8 = arith.constant 0 : index
    %28 = vector.load %arg3[%c0_7, %c0_8] : memref<1x256xf32, #tpu.memory_space<vmem>>, vector<1x256xf32>
    %29 = arith.addf %28, %27 : vector<1x256xf32>
    %c0_9 = arith.constant 0 : index
    %c0_10 = arith.constant 0 : index
    %30 = vector.load %arg3[%c0_9, %c0_10] : memref<1x256xf32, #tpu.memory_space<vmem>>, vector<1x256xf32>
    tpu.vector_store %arg3[%c0_9, %c0_10], %29 {strides = array<i32>} : memref<1x256xf32, #tpu.memory_space<vmem>>, vector<1x256xf32>,
    %c1_i32 = arith.constant 1 : i32
    %31 = arith.cmpi eq, %arg0, %c1_i32 : i32
    %32 = arith.extui %31 : i1 to i32
    %c0_i32_11 = arith.constant 0 : i32
    %33 = arith.cmpi ne, %32, %c0_i32_11 : i32
    scf.if %33 {
      %c0_12 = arith.constant 0 : index
      %c0_13 = arith.constant 0 : index
      %34 = vector.load %arg3[%c0_12, %c0_13] : memref<1x256xf32, #tpu.memory_space<vmem>>, vector<1x256xf32>
      %35 = vector.shape_cast %34 : vector<1x256xf32> to vector<1x1x256xf32>
      %cst_14 = arith.constant dense<0.000000e+00> : vector<1xf32>
      %36 = vector.multi_reduction <add>, %35, %cst_14 [1, 2] : vector<1x1x256xf32> to vector<1xf32>
      %37 = vector.shape_cast %36 : vector<1xf32> to vector<1x1x1xf32>
      %38 = vector.extract %37[0, 0, 0] : f32 from vector<1x1x1xf32>
      %c0_15 = arith.constant 0 : index
      %c0_16 = arith.constant 0 : index
      %39 = memref.load %arg2[%c0_15, %c0_16] : memref<1x1xf32, #tpu.memory_space<smem>>
      memref.store %38, %arg2[%c0_15, %c0_16] : memref<1x1xf32, #tpu.memory_space<smem>>
    } else {
    }
    return
  }
  func.func @transform_0(%arg0: i32) -> (i32, i32) {
    %c0_i32 = arith.constant 0 : i32
    %c0_i32_0 = arith.constant 0 : i32
    return %c0_i32, %arg0 : i32, i32
  }
  func.func @transform_1(%arg0: i32) -> (i32, i32) {
    %c0_i32 = arith.constant 0 : i32
    %c0_i32_0 = arith.constant 0 : i32
    %c0_i32_1 = arith.constant 0 : i32
    return %c0_i32, %c0_i32_0 : i32, i32
  }
}

</mosaic_0001>

<bundles_post_ra>
// kernel: tpu_custom_call.1
= control target key start
LH: loop header
LB: loop body
LE: loop exit
PB: predicated region body
PF: predicated region fallthrough
CT: control target
= control target key end

     0   :  { %6 = vsyncpa [#allocation4], 0  ;;  %s563_s0 = inlined_call_operand.hbm [shape: f32[3,300], index: 0, kind: input, shape index: {}]   ;;  %s564_s1 = inlined_call_operand.hbm [shape: f32[1,1], index: 1, kind: output, shape index: {}]  }
   0x1   :  { %8 = vsyncpa [#allocation4 + $0x1], 0 }
   0x2   :  { %9 = vsyncpa [#allocation5], 0  ;;  %s451_s6 = smov 0   ;;  %s453_s7 = smov 0  }
   0x3   :  { %s455_s8 = smov 0   ;;  %s457_s9 = smov 0  }
   0x4 LB: > { %s470_s10 = sadd.s32 4294967295, %s435_s9   ;;  %s473_s11 = sadd.s32 1, %s435_s9   ;;  %s435_s9 = sphi %s457_s9, %s571_s9   ;;  %s431_s8 = sphi %s455_s8, %s570_s8   ;;  %s427_s7 = sphi %s453_s7, %s569_s7   ;;  %s423_s6 = sphi %s451_s6, %s568_s6  }
   0x5   : > { %s19_s12 = ssub.s32 %s435_s9, %s473_s11  ;;  %s22_s13 = sadd.s32 1, %s431_s8 }
   0x6   : > { %p20_p0 = scmp.eq.s32.totalorder %s19_s12, 0  ;;  %p29_p1 = scmp.ne.s32.totalorder %s431_s8, %s427_s7 }
   0x7   : > { %p30_p2 = scmp.eq.s32.totalorder %s435_s9, 0  ;;  %p35_p3 = scmp.ne.s32.totalorder %s427_s7, %s423_s6 }
   0x8   : > { %s483_s14 = scalar_select %p20_p0, %s431_s8, %s22_s13  }
   0x9   : > { %p31_p4 = por %p30_p2, %p29_p1  ;;  %p36_p5 = scmp.eq.s32.totalorder %s470_s10, 0 }
   0xa   : > { %p293_p7 = scmp.ge.s32.totalorder %s435_s9, 2 }
   0xb   : > { %p486_p6 = por %p36_p5, %p35_p3 }
   0xc   : > { %76 = sbr.rel (%p293_p7) target bundleno = 53 (0x35), region = 16 }
   0xd   : > { %s566_s15 = scalar_select %p486_p6, 1, 0 }
  0x13   : > { %79 = sbr.rel (!%p31_p4) target bundleno = 53 (0x35), region = 20  ;;  %s80_s16 = sand.u32 (%p31_p4), 1, %s431_s8  }
  0x14   : > { %s295_s17 = sshll.u32 (%p31_p4), %s435_s9, 1  ;;  %s294_s18 = sshll.u32 (%p31_p4), %s80_s16, 3 }
  0x15   : > { %s86_s19 = ssub.s32 (%p31_p4), 3, %s295_s17  ;;  %s496_s22 = scalar_lea.sflag (%p31_p4), [#allocation4], %s80_s16 }
  0x16   : > { %p87_p8 = scmp.lt.s32.totalorder (%p31_p4), %s86_s19, 2  ;;  %s84_s23 = scalar_lea.vmem (%p31_p4), [#allocation3], %s294_s18 }
  0x1a   : > { %s573_s19 = smov (!%p87_p8, %s86_s19), 2 }
  0x1b   : > { %s493_s20 = sshll.u32 %s573_s19, 6 }
  0x1c   : > { %s91_s21 = ssub.s32 128, %s493_s20 }
  0x1d   : > { %92 = vsyncadd %s496_s22, %s91_s21  ;;  %p297_p9 = scmp.ne.s32.totalorder %s493_s20, 0  ;;  %s312_s24 = sshll.u32 %s435_s9, 7 }
  0x1e   : > { %s504_s27 = scalar_lea.hbm %s563_s0, %s312_s24  ;;  %s98_s28 = sshll.u32 %s84_s23, 4  ;;  %s99_s28 = int_to_ptr.vmem [resolvable:$true] %s98_s28 }
  0x1f   : > { %s357_s29 = scalar_lea.hbm %s504_s27, %s493_s20  ;;  %s361_s3 = scalar_lea.hbm %s563_s0, 192 }
  0x20   : > { %p358_p10 = scmp.ne.s32.totalorder %s504_s27, %s357_s29  ;;  %p362_p13 = scmp.lt.u32.totalorder %s504_s27, %s563_s0 }
  0x21   : > { %p363_p0 = scmp.lt.u32.totalorder %s361_s3, %s357_s29  ;;  %p365_p2 = scmp.lt.u32.totalorder %s357_s29, %s504_s27 }
  0x22   : > { %p359_p11 = pnand %p358_p10, %p297_p9 }
  0x23   : > { %p364_p1 = por %p363_p0, %p362_p13 }
  0x24   : > { %p360_p12 = pneg %p359_p11 }
  0x25   : > { %p366_p3 = por %p365_p2, %p364_p1 }
  0x27   : > { %p367_p4 = pnand %p366_p3, %p360_p12 }
  0x29   : > { %370 = shalt.err (!%p367_p4)
}
  0x2a   : > { %s371_s6 = scalar_lea.vmem %s99_s28, %s493_s20  ;;  %s437_s12 = smov [#allocation3]  }
  0x2b   : > { %p372_p5 = scmp.ne.s32.totalorder %s99_s28, %s371_s6  ;;  %s375_s13 = sshll.u32 %s437_s12, 4  ;;  %s376_s13 = int_to_ptr.vmem [resolvable:$false] %s375_s13 }
  0x2c   : > { %s377_s16 = scalar_lea.vmem %s376_s13, 256  ;;  %p378_p10 = scmp.lt.s32.totalorder %s99_s28, %s376_s13 }
  0x2d   : > { %p373_p7 = pnand %p372_p5, %p297_p9  ;;  %p379_p11 = scmp.lt.s32.totalorder %s377_s16, %s371_s6 }
  0x2f   : > { %p374_p8 = pneg %p373_p7  ;;  %p380_p6 = por %p379_p11, %p378_p10 }
  0x31   : > { %p381_p0 = pnand %p380_p6, %p374_p8 }
  0x33   : > { %384 = shalt.err (!%p381_p0)
}
  0x34   : > { %101 = dma.hbm_to_vmem [thread:$0]  (%p297_p9), %s504_s27, %s493_s20, %s99_s28, %s496_s22  }
  0x35 PF: > { %p301_p12 = scmp.ge.s32.totalorder %s435_s9, 1  ;;  %p103_p13 = scmp.lt.s32.totalorder %s435_s9, 3 }
  0x37   : > { %p104_p1 = pnand %p301_p12, %p103_p13 }
  0x38   : > { %s109_s17 = sand.u32 (!%p104_p1), 1, %s427_s7   ;;  %p567_p6 = scmp.ne.s32.totalorder (!%p104_p1), %s566_s15, 0 }
  0x39   : > { %107 = sbr.rel (%p104_p1) target bundleno = 329 (0x149), region = 24  ;;  %s302_s18 = sshll.u32 (!%p104_p1), %s109_s17, 3 }
  0x3a   : > { %s110_s19 = scalar_lea.sflag (!%p104_p1), [#allocation4], %s109_s17  ;;  %s113_s21 = scalar_lea.vmem (!%p104_p1), [#allocation3], %s302_s18 }
  0x40   : > { %414 = dma.done.wait (%p567_p6), %s110_s19, 128  }
  0x41   : > { %416 = vsyncadd (%p567_p6), %s110_s19, 4294967168  ;;  %p303_p9 = scmp.ne.s32.totalorder %s470_s10, 0 }
  0x42   : > { %v136_v0 = vlaneseq (!%p303_p9)  ;;  %v438_v1 = vmov (!%p303_p9), 0.0  }
  0x43   : > { %135 = sbr.rel (%p303_p9) target bundleno = 74 (0x4a), region = 32 }
  0x44   : > { %vm138_vm0 = vcmp.lt.s32.totalorder (!%p303_p9), %v136_v0, 256 }
  0x45   : > { %140 = vst.msk [vmem:[#allocation2] sm:$0x3] (!%p303_p9), %vm138_vm0, %v438_v1 }
  0x4a PF: > { %v141_v2 = vld [vmem:[%s113_s21] sm:$0x77]  ;;  %v157_v3 = vlaneseq  ;;  %s306_s9 = sshll.u32 %s470_s10, 8  ;;  %v439_v13 = vmov 1966171168   ;;  %p307_p2 = scmp.ne.s32.totalorder %s470_s10, 1 }
  0x4b   : > { %v142_v4 = vsub.f32 0.1, %v141_v2  ;;  %v304_v5 = vrot.slane %v141_v2, 9  ;;  %v305_v6 = vrot.slane %v141_v2, 10  ;;  %v161_v10 = vstv %s306_s9 }
  0x4c   : > { %v158_v7 = vand.u32 127, %v157_v3  ;;  %v168_v11 = vshrl.u32 %v157_v3, 7  ;;  %v184_v14 = vunpack.c.l.s4 %v439_v13  ;;  %v179_v32 = vld [vmem:[#allocation2] sm:$0x3]  ;;  %vm201_vm3 = vcmp.lt.s32.totalorder %v157_v3, 256 }
  0x4d   : > { %v147_v8 = vadd.f32 %v304_v5, %v142_v4  ;;  %v153_v9 = vadd.f32 %v305_v6, %v142_v4  ;;  %vm220_vm4 = vcmask (!%p307_p2), 1040384  }
  0x4e   : > { %v159_v12 = vadd.s32 128, %v158_v7  ;;  %v162_v17 = vadd.s32 %v161_v10, %v158_v7  ;;  %v169_v21 = vsub.s32 0, %v168_v11  ;;  %v173_v22 = vsub.s32 4, %v168_v11 }
  0x4f   : > { %v148_v15 = vmax.f32 %v147_v8, 0.0  ;;  %v154_v16 = vmax.f32 %v153_v9, 0.0  ;;  %v185_v23 = vunpack.c.0.s8 %v184_v14  ;;  %v216_v36 = vsub.s32 (!%p307_p2), 1, %v168_v11 }
  0x50   : > { %v163_v18 = vadd.s32 %v161_v10, %v159_v12  ;;  %vm164_vm1 = vcmp.lt.s32.totalorder %v162_v17, 300 }
  0x51   : > { %v149_v19 = vmul.f32 0.006666667, %v148_v15  ;;  %v155_v20 = vmul.f32 0.01, %v154_v16  ;;  %v188_v27 = vsub.s32 %v185_v23, %v168_v11 }
  0x52   : > { %vm165_vm2 = vcmp.lt.s32.totalorder %v163_v18, 300 }
  0x53   : > { %v156_v24 = vadd.f32 %v155_v20, %v149_v19 }
  0x55   : > { %v170_v25 = vrot.slane %v156_v24, %v169_v21  ;;  %v174_v26 = vrot.slane %v156_v24, %v173_v22 }
  0x57   : > { %v177_v28 = vsel %vm164_vm1, %v170_v25, 0.0  ;;  %v178_v29 = vsel %vm165_vm2, %v174_v26, 0.0 }
  0x58   : > { %v182_v30 = vcombine.low %v177_v28, %v178_v29 }
  0x5a   : > { %v189_v31 = vrot.slane %v182_v30, %v188_v27  ;;  %207 = sbr.rel (%p307_p2) target bundleno = 314 (0x13a), region = 36 }
  0x5c   : > { %v196_v33 = vrot.slane %v189_v31, %v188_v27 }
  0x5e   : > { %v198_v34 = vadd.f32 %v196_v33, %v179_v32 }
  0x60   : > { %203 = vst.msk [vmem:[#allocation2] sm:$0x3] %vm201_vm3, %v198_v34 }
  0x67   : > { %v208_v35 = vld [vmem:[#allocation2] sm:$0x3] }
  0x68   : > { %v213_v37 = vrot.slane %v208_v35, %v169_v21  ;;  %v217_v38 = vrot.slane %v208_v35, %v216_v36 }
  0x6a   : > { %v221_v39 = vsel %vm220_vm4, %v213_v37, 0.0  ;;  %v222_v40 = vsel %vm220_vm4, %v217_v38, 0.0 }
  0x6b   : > { %v223_v41 = vadd.f32 %v222_v40, %v221_v39 }
  0x6d   : > { %224 = vadd.xlane.f32.xlu0 %v223_v41 }
  0xfa   : > { %v225_v42 = vpop.xlane.xlu0 %224 }
  0xfb   : > { %v226_v43 = vrot.slane %v225_v42, 4 }
  0xfd   : > { %v227_v44 = vadd.f32 %v226_v43, %v225_v42 }
  0xff   : > { %v228_v45 = vrot.slane %v227_v44, 2 }
 0x101   : > { %v229_v46 = vadd.f32 %v228_v45, %v227_v44 }
 0x103   : > { %v230_v47 = vrot.slane %v229_v46, 1 }
 0x105   : > { %v231_v48 = vadd.f32 %v230_v47, %v229_v46 }
 0x107   : > { %313 = vpush %v231_v48 }
 0x138   : > { %s314_s15 = spop %313 }
 0x139   : > { %234 = sst [smem:[#allocation6]] %s314_s15 }
 0x13a PF: > { %p320_p3 = scmp.eq.s32.totalorder %s470_s10, 1  ;;  %s385_s23 = scalar_lea.hbm %s564_s1, 16 }
 0x13b   : > { %p386_p4 = scmp.ne.s32.totalorder %s564_s1, %s385_s23  ;;  %p391_p8 = scmp.lt.u32.totalorder %s385_s23, %s564_s1 }
 0x13d   : > { %p387_p5 = pnand %p386_p4, %p320_p3 }
 0x13f   : > { %p388_p7 = pneg %p387_p5 }
 0x141   : > { %p393_p10 = pnand %p391_p8, %p388_p7 }
 0x143   : > { %396 = shalt.err (!%p393_p10)
}
 0x144   : > { %s440_s28 = smov [#allocation6]  }
 0x145   : > { %317 = dma.smem_to_hbm (%p320_p3), %s440_s28, 16, %s564_s1, [#allocation5]  }
 0x146   : > { %418 = dma.done.wait (%p320_p3), [#allocation5], 16  }
 0x147   : > { %420 = vsyncadd (%p320_p3), [#allocation5], 4294967280 }
 0x148   : > { %248 = sfence }
 0x149 PF: > { %p12_p11 = scmp.ge.s32.totalorder %s473_s11, 4   ;;  %s568_s6 = smov %s427_s7 }
 0x14a   : > { %s569_s7 = smov %s431_s8  ;;  %s570_s8 = smov %s483_s14 }
 0x14b   : > { %s571_s9 = smov %s473_s11  ;;  %14 = sbr.rel (!%p12_p11) target bundleno = 4 (0x4), region = 70 }
 0x152   :  { %254 = vsyncpa [#allocation4], 1 }
 0x153   :  { %256 = vsyncpa [#allocation4 + $0x1], 1 }
 0x154   :  { %257 = vsyncpa [#allocation5], 1 }
 0x155   :  { %259 = vsyncpa [#allocation5 + $0x1], 1 }

</bundles_post_ra>
